<compile_context>
chip_gen: v5e
topology: v5e:2x2
jax: 0.10.0
libtpu: 0.0.40
codegen_flags: <defaults>
</compile_context>

<pallas_src>
import functools

import jax
import jax.numpy as jnp
from jax.experimental import pallas as pl
from jax.experimental.pallas import tpu as pltpu

EPS = 1e-5


# ---------------------------------------------------------------------------
# Pass 1: per-(batch, m-tile) partial sums / sums-of-squares of g1 = Wg@g and
# x1 = Wx@x.  Per-tile outputs -> no grid-resident accumulator, both grid axes
# are "parallel".  Padded (zero) lanes contribute zero, so no mask is needed.
# ---------------------------------------------------------------------------
def _stats_kernel(g_ref, x_ref, wg_ref, wx_ref, stats_ref):
    g1 = jnp.dot(wg_ref[...], g_ref[...], preferred_element_type=jnp.float32)
    x1 = jnp.dot(wx_ref[...], x_ref[...], preferred_element_type=jnp.float32)
    sg = jnp.sum(g1, axis=1, keepdims=True)
    sgg = jnp.sum(g1 * g1, axis=1, keepdims=True)
    sx = jnp.sum(x1, axis=1, keepdims=True)
    sxx = jnp.sum(x1 * x1, axis=1, keepdims=True)
    # Single lane-concatenated store (no read-modify-write accumulation).
    stats_ref[...] = jnp.concatenate([sg, sgg, sx, sxx], axis=1)


# ---------------------------------------------------------------------------
# Pass 2: p = Conv1x1_psi(relu(BN(g1)+BN(x1))) with the BN scales folded into
# the conv weights and a single combined shift; also per-tile partial stats of
# p for psi's BatchNorm(1).  Padded lanes would contribute relu(shift) != 0,
# so they are masked out of the stats (p itself on padded lanes is unused).
# ---------------------------------------------------------------------------
def _psi_pre_kernel(g_ref, x_ref, wg_ref, wx_ref, shift_ref, wpsi_ref,
                    p_ref, pstats_ref, *, hw_valid, tm):
    g1 = jnp.dot(wg_ref[...], g_ref[...], preferred_element_type=jnp.float32)
    x1 = jnp.dot(wx_ref[...], x_ref[...], preferred_element_type=jnp.float32)
    s = jnp.maximum(g1 + x1 + shift_ref[...], 0.0)            # (F_int, TM) f32
    # VPU multiply + sublane reduce (free filler while the pass is HBM-bound).
    # TODO(synk): switch to an MXU matvec (jnp.dot(wpsi.T, s)) if profiling
    # shows this pass VALU/XLU-bound at large F_int.
    p = jnp.sum(wpsi_ref[...] * s, axis=0, keepdims=True)      # (1, TM) f32
    p_ref[...] = p.astype(p_ref.dtype)

    lane = jax.lax.broadcasted_iota(jnp.int32, (1, tm), 1)
    valid = (pl.program_id(1) * tm + lane) < hw_valid
    pm = jnp.where(valid, p, 0.0)
    ps = jnp.sum(pm, axis=1, keepdims=True)
    psq = jnp.sum(pm * pm, axis=1, keepdims=True)
    pstats_ref[...] = jnp.concatenate([ps, psq], axis=1)


# ---------------------------------------------------------------------------
# Pass 3: out = x * sigmoid(scale_p * p + shift_p).  Fully parallel over the
# grid; x aliased with the output; the two BN(1) coefficients live in SMEM.
# ---------------------------------------------------------------------------
def _gate_kernel(x_ref, p_ref, coef_ref, out_ref):
    scale_p = coef_ref[0]
    shift_p = coef_ref[1]
    psi = jax.nn.sigmoid(p_ref[...] * scale_p + shift_p)       # (1, TM) f32
    out_ref[...] = (x_ref[...].astype(jnp.float32) * psi).astype(out_ref.dtype)
    # TODO(synk): try pipeline_mode=pl.Buffered(3) on x/p specs on v5e if
    # exposed DMA latency shows up in this pure-streaming pass.


def _vmem_limit_bytes():
    """Per-generation scoped-VMEM cap, with headroom under physical VMEM."""
    try:
        cap = pltpu.get_tpu_info().vmem_capacity_bytes
    except Exception:
        cap = 64 * 1024 * 1024
    if cap >= 100 * 1024 * 1024:        # v5e / v6e: 128 MiB per TensorCore
        return 96 * 1024 * 1024
    return 44 * 1024 * 1024             # v7x: 64 MiB per TensorCore


def _m_tile(hw, f_g, f_l, dtype_bytes, vmem_limit):
    """Channel- and generation-aware spatial tile: largest multiple of 128
    whose double-buffered g/x input tiles fit in ~half the VMEM budget,
    capped at 2048 (HBM roofline is already ~85%+ at 512-1024)."""
    budget = vmem_limit // 2
    per_lane = 2 * (f_g + f_l) * dtype_bytes         # 2x = double buffering
    tm = (budget // max(per_lane, 1)) // 128 * 128
    tm = max(128, min(tm, 2048))
    hw_pad128 = -(-hw // 128) * 128
    return min(tm, hw_pad128)


@functools.partial(jax.jit, static_argnames=("compute_dtype",))
def attention_block(g, x, params, compute_dtype=jnp.bfloat16):
    """g: (N, F_g, H, W), x: (N, F_l, H, W). Returns x * psi(g, x) with
    training-mode BatchNorm statistics (matches the PyTorch module in train
    mode).  Streaming/matmul operands in `compute_dtype`; stats in f32."""
    N, F_g, H, W = g.shape
    _, F_l, _, _ = x.shape
    F_int = params["wg"].shape[0]
    HW = H * W
    M = N * HW                            # true element count for BN stats
    f32 = jnp.float32
    cdt = jnp.dtype(compute_dtype)
    db = cdt.itemsize

    vmem_limit = _vmem_limit_bytes()
    tm = _m_tile(HW, F_g, F_l, db, vmem_limit)
    HW_pad = -(-HW // tm) * tm
    pad = HW_pad - HW
    num_m = HW_pad // tm
    grid = (N, num_m)

    # NCHW is already channels-major: (N, C, H*W) is the desired (C, M) layout
    # per batch element -> no HBM transpose; stream in compute_dtype.
    g3 = g.reshape(N, F_g, HW).astype(cdt)
    x3 = x.reshape(N, F_l, HW).astype(cdt)
    if pad:
        g3 = jnp.pad(g3, ((0, 0), (0, 0), (0, pad)))
        x3 = jnp.pad(x3, ((0, 0), (0, 0), (0, pad)))

    wg = params["wg"].reshape(F_int, F_g).astype(f32)
    wx = params["wx"].reshape(F_int, F_l).astype(f32)
    wpsi = params["wpsi"].reshape(F_int, 1).astype(f32)

    cp = pltpu.CompilerParams(
        dimension_semantics=("parallel", "parallel"),
        vmem_limit_bytes=vmem_limit)

    g_spec = pl.BlockSpec((None, F_g, tm), lambda n, m: (n, 0, m))
    x_spec = pl.BlockSpec((None, F_l, tm), lambda n, m: (n, 0, m))
    p_spec = pl.BlockSpec((None, 1, tm), lambda n, m: (n, 0, m))
    wg_spec = pl.BlockSpec((F_int, F_g), lambda n, m: (0, 0))
    wx_spec = pl.BlockSpec((F_int, F_l), lambda n, m: (0, 0))
    col_spec = pl.BlockSpec((F_int, 1), lambda n, m: (0, 0))

    # ---- pass 1: global training-mode BN statistics of g1 and x1 -----------
    stats = pl.pallas_call(
        _stats_kernel,
        out_shape=jax.ShapeDtypeStruct((N, num_m, F_int, 4), f32),
        grid=grid,
        in_specs=[g_spec, x_spec, wg_spec, wx_spec],
        out_specs=pl.BlockSpec((None, None, F_int, 4),
                               lambda n, m: (n, m, 0, 0)),
        compiler_params=cp,
        cost_estimate=pl.CostEstimate(
            flops=2 * M * F_int * (F_g + F_l) + 4 * M * F_int,
            transcendentals=0,
            bytes_accessed=db * M * (F_g + F_l)),
    )(g3, x3, wg.astype(cdt), wx.astype(cdt))

    tot = jnp.sum(stats, axis=(0, 1))                  # (F_int, 4)
    # TODO(synk): single-pass E[v^2]-mean^2 can cancel when var << mean^2 at
    # very large M; switch to per-tile centered partials + Chan combine if BN
    # statistics drift at scale.
    mean_g, msq_g = tot[:, 0] / M, tot[:, 1] / M
    mean_x, msq_x = tot[:, 2] / M, tot[:, 3] / M
    var_g = jnp.maximum(msq_g - mean_g * mean_g, 0.0)
    var_x = jnp.maximum(msq_x - mean_x * mean_x, 0.0)
    scale_g = params["gamma_g"].astype(f32) * jax.lax.rsqrt(var_g + EPS)
    scale_x = params["gamma_x"].astype(f32) * jax.lax.rsqrt(var_x + EPS)
    shift_g = params["beta_g"].astype(f32) - mean_g * scale_g
    shift_x = params["beta_x"].astype(f32) - mean_x * scale_x

    # Fold BN scales into the 1x1-conv weights (in f32, then cast to the
    # streaming dtype); shifts combine into one per-channel column.
    wg_s = (wg * scale_g[:, None]).astype(cdt)
    wx_s = (wx * scale_x[:, None]).astype(cdt)
    shift_gx = (shift_g + shift_x)[:, None]            # (F_int, 1) f32

    # ---- pass 2: p = Conv1x1_psi(relu(BN(g1)+BN(x1))) + its global stats ----
    psi_kernel = functools.partial(_psi_pre_kernel, hw_valid=HW, tm=tm)
    p3, pstats = pl.pallas_call(
        psi_kernel,
        out_shape=(jax.ShapeDtypeStruct((N, 1, HW_pad), f32),
                   jax.ShapeDtypeStruct((N, num_m, 1, 2), f32)),
        grid=grid,
        in_specs=[g_spec, x_spec, wg_spec, wx_spec, col_spec, col_spec],
        out_specs=(p_spec,
                   pl.BlockSpec((None, None, 1, 2), lambda n, m: (n, m, 0, 0))),
        compiler_params=cp,
        cost_estimate=pl.CostEstimate(
            flops=2 * M * F_int * (F_g + F_l) + 5 * M * F_int,
            transcendentals=0,
            bytes_accessed=db * M * (F_g + F_l) + 4 * M),
    )(g3, x3, wg_s, wx_s, shift_gx, wpsi)
    # TODO(synk): on v5e, if this pass is MXU-bound, store g1/x1 (bf16) to HBM
    # in pass 1 and re-read here instead of re-running both dots.

    ptot = jnp.sum(pstats, axis=(0, 1)).reshape(2)
    mean_p = ptot[0] / M
    var_p = jnp.maximum(ptot[1] / M - mean_p * mean_p, 0.0)
    scale_p = params["gamma_p"].astype(f32) * jax.lax.rsqrt(var_p + EPS)
    shift_p = params["beta_p"].astype(f32) - mean_p * scale_p
    coef = jnp.concatenate([scale_p, shift_p])          # (2,) f32 -> SMEM

    # ---- pass 3: out = x * sigmoid(BN(p)); x aliased with the output --------
    out3 = pl.pallas_call(
        _gate_kernel,
        out_shape=jax.ShapeDtypeStruct((N, F_l, HW_pad), cdt),
        grid=grid,
        in_specs=[x_spec, p_spec,
                  pl.BlockSpec(memory_space=pltpu.MemorySpace.SMEM)],
        out_specs=x_spec,
        input_output_aliases={0: 0},
        compiler_params=cp,
        cost_estimate=pl.CostEstimate(
            flops=3 * M * F_l,
            transcendentals=M,
            bytes_accessed=db * 2 * M * F_l + 4 * M),
    )(x3, p3, coef)

    if pad:
        out3 = out3[:, :, :HW]
    return out3.reshape(N, F_l, H, W)


def _reference(g, x, params, compute_dtype=jnp.float32):
    """Pure-JAX reference mirroring the PyTorch forward (training-mode BN).
    `compute_dtype` optionally emulates the kernel's streaming precision."""
    f32 = jnp.float32
    N, F_g, H, W = g.shape
    F_l = x.shape[1]
    F_int = params["wg"].shape[0]
    M = N * H * W
    cd = lambda a: a.astype(compute_dtype).astype(f32)
    gf = cd(jnp.transpose(g, (0, 2, 3, 1)).reshape(M, F_g))
    xf = cd(jnp.transpose(x, (0, 2, 3, 1)).reshape(M, F_l))
    wg = cd(params["wg"].reshape(F_int, F_g))
    wx = cd(params["wx"].reshape(F_int, F_l))
    wpsi = cd(params["wpsi"].reshape(1, F_int))

    def bn(v, gam, bet):
        mean = jnp.mean(v, axis=0, keepdims=True)
        var = jnp.mean((v - mean) ** 2, axis=0, keepdims=True)
        return ((v - mean) / jnp.sqrt(var + EPS) * gam.reshape(1, -1)
                + bet.reshape(1, -1))

    hp = jax.lax.Precision.HIGHEST
    g1 = bn(jnp.dot(gf, wg.T, precision=hp), params["gamma_g"], params["beta_g"])
    x1 = bn(jnp.dot(xf, wx.T, precision=hp), params["gamma_x"], params["beta_x"])
    s = jnp.maximum(g1 + x1, 0.0)
    p = bn(jnp.dot(s, wpsi.T, precision=hp), params["gamma_p"], params["beta_p"])
    psi = jax.nn.sigmoid(p)
    out = xf * psi
    return jnp.transpose(out.reshape(N, H, W, F_l), (0, 3, 1, 2))


if __name__ == "__main__":
    # Small shapes: batch=2, F_g=F_l=4, F_int=8, spatial=16x16.
    N, F_g, F_l, F_int, H, W = 2, 4, 4, 8, 16, 16

    key = jax.random.PRNGKey(0)
    k = jax.random.split(key, 10)

    g = jax.random.normal(k[0], (N, F_g, H, W), dtype=jnp.float32)
    x = jax.random.normal(k[1], (N, F_l, H, W), dtype=jnp.float32)

    params = {
        # Conv2d(k=1, bias=False) weights, shape (C_out, C_in, 1, 1)
        "wg":   0.1 * jax.random.normal(k[2], (F_int, F_g, 1, 1), dtype=jnp.float32),
        "wx":   0.1 * jax.random.normal(k[3], (F_int, F_l, 1, 1), dtype=jnp.float32),
        "wpsi": 0.1 * jax.random.normal(k[4], (1, F_int, 1, 1), dtype=jnp.float32),
        # BatchNorm affine params (deterministic, non-trivial)
        "gamma_g": 1.0 + 0.1 * jax.random.normal(k[5], (F_int,), dtype=jnp.float32),
        "beta_g":  0.1 * jax.random.normal(k[6], (F_int,), dtype=jnp.float32),
        "gamma_x": 1.0 + 0.1 * jax.random.normal(k[7], (F_int,), dtype=jnp.float32),
        "beta_x":  0.1 * jax.random.normal(k[8], (F_int,), dtype=jnp.float32),
        "gamma_p": jnp.ones((1,), dtype=jnp.float32),
        "beta_p":  0.1 * jax.random.normal(k[9], (1,), dtype=jnp.float32),
    }

    # f32 path: tight algorithmic check against the pure-JAX reference.
    out_f32 = jax.block_until_ready(
        attention_block(g, x, params, compute_dtype=jnp.float32))
    ref_f32 = _reference(g, x, params)
    assert out_f32.shape == (N, F_l, H, W)
    assert jnp.allclose(out_f32.astype(jnp.float32), ref_f32,
                        rtol=2e-3, atol=2e-3), "f32 kernel mismatch vs reference"

    # bf16 streaming path (the perf default): loose check vs a bf16-emulating
    # reference.
    out_bf16 = jax.block_until_ready(attention_block(g, x, params))
    ref_bf16 = _reference(g, x, params, compute_dtype=jnp.bfloat16)
    assert out_bf16.shape == (N, F_l, H, W)
    assert jnp.allclose(out_bf16.astype(jnp.float32), ref_bf16,
                        rtol=5e-2, atol=5e-2), "bf16 kernel mismatch vs reference"

    print("KERNEL_OK")
</pallas_src>

<mosaic_0001>
module attributes {stable_mosaic.version = 11 : i64} {
  func.func @_stats_kernel(%arg0: i32, %arg1: i32, %arg2: memref<1x4x256xf32, #tpu.memory_space<vmem>>, %arg3: memref<1x4x256xf32, #tpu.memory_space<vmem>>, %arg4: memref<8x4xf32, #tpu.memory_space<vmem>>, %arg5: memref<8x4xf32, #tpu.memory_space<vmem>>, %arg6: memref<1x1x8x4xf32, #tpu.memory_space<vmem>>) attributes {dimension_semantics = [#tpu.dimension_semantics<parallel>, #tpu.dimension_semantics<parallel>], iteration_bounds = array<i64: 2, 1>, scalar_prefetch = 0 : i64, scratch_operands = 0 : i64, tpu.core_type = #tpu.core_type<tc>, window_params = [{transform_indices = @transform_0, window_bounds = array<i64: 1, 4, 256>}, {transform_indices = @transform_1, window_bounds = array<i64: 1, 4, 256>}, {pipeline_mode = #tpu.pipeline_mode<synchronous>, transform_indices = @transform_2, window_bounds = array<i64: 8, 4>}, {pipeline_mode = #tpu.pipeline_mode<synchronous>, transform_indices = @transform_3, window_bounds = array<i64: 8, 4>}, {transform_indices = @transform_4, window_bounds = array<i64: 1, 1, 8, 4>}]} {
    %c0 = arith.constant 0 : index
    %c0_0 = arith.constant 0 : index
    %0 = vector.load %arg4[%c0, %c0_0] : memref<8x4xf32, #tpu.memory_space<vmem>>, vector<8x4xf32>
    %c0_1 = arith.constant 0 : index
    %c0_2 = arith.constant 0 : index
    %c0_3 = arith.constant 0 : index
    %1 = vector.load %arg2[%c0_1, %c0_2, %c0_3] : memref<1x4x256xf32, #tpu.memory_space<vmem>>, vector<1x4x256xf32>
    %2 = vector.shape_cast %1 : vector<1x4x256xf32> to vector<4x256xf32>
    %cst = arith.constant dense<0.000000e+00> : vector<8x256xf32>
    %3 = tpu.matmul %0, %2, %cst {dimension_numbers = #tpu.dot_dimension_numbers<[1], [0], [0], [1], [0, 0, 1, 1], [], []>} : vector<8x4xf32>, vector<4x256xf32>, vector<8x256xf32> -> vector<8x256xf32>
    %c0_4 = arith.constant 0 : index
    %c0_5 = arith.constant 0 : index
    %4 = vector.load %arg5[%c0_4, %c0_5] : memref<8x4xf32, #tpu.memory_space<vmem>>, vector<8x4xf32>
    %c0_6 = arith.constant 0 : index
    %c0_7 = arith.constant 0 : index
    %c0_8 = arith.constant 0 : index
    %5 = vector.load %arg3[%c0_6, %c0_7, %c0_8] : memref<1x4x256xf32, #tpu.memory_space<vmem>>, vector<1x4x256xf32>
    %6 = vector.shape_cast %5 : vector<1x4x256xf32> to vector<4x256xf32>
    %cst_9 = arith.constant dense<0.000000e+00> : vector<8x256xf32>
    %7 = tpu.matmul %4, %6, %cst_9 {dimension_numbers = #tpu.dot_dimension_numbers<[1], [0], [0], [1], [0, 0, 1, 1], [], []>} : vector<8x4xf32>, vector<4x256xf32>, vector<8x256xf32> -> vector<8x256xf32>
    %cst_10 = arith.constant dense<0.000000e+00> : vector<8xf32>
    %8 = vector.multi_reduction <add>, %3, %cst_10 [1] : vector<8x256xf32> to vector<8xf32>
    %9 = vector.shape_cast %8 : vector<8xf32> to vector<8x1xf32>
    %10 = arith.mulf %3, %3 : vector<8x256xf32>
    %cst_11 = arith.constant dense<0.000000e+00> : vector<8xf32>
    %11 = vector.multi_reduction <add>, %10, %cst_11 [1] : vector<8x256xf32> to vector<8xf32>
    %12 = vector.shape_cast %11 : vector<8xf32> to vector<8x1xf32>
    %cst_12 = arith.constant dense<0.000000e+00> : vector<8xf32>
    %13 = vector.multi_reduction <add>, %7, %cst_12 [1] : vector<8x256xf32> to vector<8xf32>
    %14 = vector.shape_cast %13 : vector<8xf32> to vector<8x1xf32>
    %15 = arith.mulf %7, %7 : vector<8x256xf32>
    %cst_13 = arith.constant dense<0.000000e+00> : vector<8xf32>
    %16 = vector.multi_reduction <add>, %15, %cst_13 [1] : vector<8x256xf32> to vector<8xf32>
    %17 = vector.shape_cast %16 : vector<8xf32> to vector<8x1xf32>
    %18 = tpu.concatenate %9, %12, %14, %17 in 1 : vector<8x1xf32>, vector<8x1xf32>, vector<8x1xf32>, vector<8x1xf32> -> vector<8x4xf32>
    %c0_14 = arith.constant 0 : index
    %c0_15 = arith.constant 0 : index
    %c0_16 = arith.constant 0 : index
    %c0_17 = arith.constant 0 : index
    %19 = vector.load %arg6[%c0_14, %c0_15, %c0_16, %c0_17] : memref<1x1x8x4xf32, #tpu.memory_space<vmem>>, vector<1x1x8x4xf32>
    %20 = vector.shape_cast %19 : vector<1x1x8x4xf32> to vector<8x4xf32>
    %21 = vector.shape_cast %18 : vector<8x4xf32> to vector<1x1x8x4xf32>
    tpu.vector_store %arg6[%c0_14, %c0_15, %c0_16, %c0_17], %21 {strides = array<i32>} : memref<1x1x8x4xf32, #tpu.memory_space<vmem>>, vector<1x1x8x4xf32>,
    return
  }
  func.func @transform_0(%arg0: i32, %arg1: i32) -> (i32, i32, i32) {
    %c0_i32 = arith.constant 0 : i32
    %c0_i32_0 = arith.constant 0 : i32
    return %arg0, %c0_i32, %arg1 : i32, i32, i32
  }
  func.func @transform_1(%arg0: i32, %arg1: i32) -> (i32, i32, i32) {
    %c0_i32 = arith.constant 0 : i32
    %c0_i32_0 = arith.constant 0 : i32
    return %arg0, %c0_i32, %arg1 : i32, i32, i32
  }
  func.func @transform_2(%arg0: i32, %arg1: i32) -> (i32, i32) {
    %c0_i32 = arith.constant 0 : i32
    %c0_i32_0 = arith.constant 0 : i32
    %c0_i32_1 = arith.constant 0 : i32
    return %c0_i32, %c0_i32_0 : i32, i32
  }
  func.func @transform_3(%arg0: i32, %arg1: i32) -> (i32, i32) {
    %c0_i32 = arith.constant 0 : i32
    %c0_i32_0 = arith.constant 0 : i32
    %c0_i32_1 = arith.constant 0 : i32
    return %c0_i32, %c0_i32_0 : i32, i32
  }
  func.func @transform_4(%arg0: i32, %arg1: i32) -> (i32, i32, i32, i32) {
    %c0_i32 = arith.constant 0 : i32
    %c0_i32_0 = arith.constant 0 : i32
    %c0_i32_1 = arith.constant 0 : i32
    return %arg0, %arg1, %c0_i32, %c0_i32_0 : i32, i32, i32, i32
  }
}

module attributes {stable_mosaic.version = 11 : i64} {
  func.func @_psi_pre_kernel(%arg0: i32, %arg1: i32, %arg2: memref<1x4x256xf32, #tpu.memory_space<vmem>>, %arg3: memref<1x4x256xf32, #tpu.memory_space<vmem>>, %arg4: memref<8x4xf32, #tpu.memory_space<vmem>>, %arg5: memref<8x4xf32, #tpu.memory_space<vmem>>, %arg6: memref<8x1xf32, #tpu.memory_space<vmem>>, %arg7: memref<8x1xf32, #tpu.memory_space<vmem>>, %arg8: memref<1x1x256xf32, #tpu.memory_space<vmem>>, %arg9: memref<1x1x1x2xf32, #tpu.memory_space<vmem>>) attributes {dimension_semantics = [#tpu.dimension_semantics<parallel>, #tpu.dimension_semantics<parallel>], iteration_bounds = array<i64: 2, 1>, scalar_prefetch = 0 : i64, scratch_operands = 0 : i64, tpu.core_type = #tpu.core_type<tc>, window_params = [{transform_indices = @transform_0, window_bounds = array<i64: 1, 4, 256>}, {transform_indices = @transform_1, window_bounds = array<i64: 1, 4, 256>}, {pipeline_mode = #tpu.pipeline_mode<synchronous>, transform_indices = @transform_2, window_bounds = array<i64: 8, 4>}, {pipeline_mode = #tpu.pipeline_mode<synchronous>, transform_indices = @transform_3, window_bounds = array<i64: 8, 4>}, {pipeline_mode = #tpu.pipeline_mode<synchronous>, transform_indices = @transform_4, window_bounds = array<i64: 8, 1>}, {pipeline_mode = #tpu.pipeline_mode<synchronous>, transform_indices = @transform_5, window_bounds = array<i64: 8, 1>}, {transform_indices = @transform_6, window_bounds = array<i64: 1, 1, 256>}, {transform_indices = @transform_7, window_bounds = array<i64: 1, 1, 1, 2>}]} {
    %c0 = arith.constant 0 : index
    %c0_0 = arith.constant 0 : index
    %0 = vector.load %arg4[%c0, %c0_0] : memref<8x4xf32, #tpu.memory_space<vmem>>, vector<8x4xf32>
    %c0_1 = arith.constant 0 : index
    %c0_2 = arith.constant 0 : index
    %c0_3 = arith.constant 0 : index
    %1 = vector.load %arg2[%c0_1, %c0_2, %c0_3] : memref<1x4x256xf32, #tpu.memory_space<vmem>>, vector<1x4x256xf32>
    %2 = vector.shape_cast %1 : vector<1x4x256xf32> to vector<4x256xf32>
    %cst = arith.constant dense<0.000000e+00> : vector<8x256xf32>
    %3 = tpu.matmul %0, %2, %cst {dimension_numbers = #tpu.dot_dimension_numbers<[1], [0], [0], [1], [0, 0, 1, 1], [], []>} : vector<8x4xf32>, vector<4x256xf32>, vector<8x256xf32> -> vector<8x256xf32>
    %c0_4 = arith.constant 0 : index
    %c0_5 = arith.constant 0 : index
    %4 = vector.load %arg5[%c0_4, %c0_5] : memref<8x4xf32, #tpu.memory_space<vmem>>, vector<8x4xf32>
    %c0_6 = arith.constant 0 : index
    %c0_7 = arith.constant 0 : index
    %c0_8 = arith.constant 0 : index
    %5 = vector.load %arg3[%c0_6, %c0_7, %c0_8] : memref<1x4x256xf32, #tpu.memory_space<vmem>>, vector<1x4x256xf32>
    %6 = vector.shape_cast %5 : vector<1x4x256xf32> to vector<4x256xf32>
    %cst_9 = arith.constant dense<0.000000e+00> : vector<8x256xf32>
    %7 = tpu.matmul %4, %6, %cst_9 {dimension_numbers = #tpu.dot_dimension_numbers<[1], [0], [0], [1], [0, 0, 1, 1], [], []>} : vector<8x4xf32>, vector<4x256xf32>, vector<8x256xf32> -> vector<8x256xf32>
    %8 = arith.addf %3, %7 : vector<8x256xf32>
    %c0_10 = arith.constant 0 : index
    %c0_11 = arith.constant 0 : index
    %9 = vector.load %arg6[%c0_10, %c0_11] : memref<8x1xf32, #tpu.memory_space<vmem>>, vector<8x1xf32>
    %10 = vector.broadcast %9 : vector<8x1xf32> to vector<8x256xf32>
    %11 = arith.addf %8, %10 : vector<8x256xf32>
    %cst_12 = arith.constant 0.000000e+00 : f32
    %12 = vector.broadcast %cst_12 : f32 to vector<8x256xf32>
    %13 = arith.maximumf %11, %12 : vector<8x256xf32>
    %c0_13 = arith.constant 0 : index
    %c0_14 = arith.constant 0 : index
    %14 = vector.load %arg7[%c0_13, %c0_14] : memref<8x1xf32, #tpu.memory_space<vmem>>, vector<8x1xf32>
    %15 = vector.broadcast %14 : vector<8x1xf32> to vector<8x256xf32>
    %16 = arith.mulf %15, %13 : vector<8x256xf32>
    %cst_15 = arith.constant dense<0.000000e+00> : vector<256xf32>
    %17 = vector.multi_reduction <add>, %16, %cst_15 [0] : vector<8x256xf32> to vector<256xf32>
    %18 = vector.shape_cast %17 : vector<256xf32> to vector<1x256xf32>
    %c0_16 = arith.constant 0 : index
    %c0_17 = arith.constant 0 : index
    %c0_18 = arith.constant 0 : index
    %19 = vector.load %arg8[%c0_16, %c0_17, %c0_18] : memref<1x1x256xf32, #tpu.memory_space<vmem>>, vector<1x1x256xf32>
    %20 = vector.shape_cast %19 : vector<1x1x256xf32> to vector<1x256xf32>
    %21 = vector.shape_cast %18 : vector<1x256xf32> to vector<1x1x256xf32>
    tpu.vector_store %arg8[%c0_16, %c0_17, %c0_18], %21 {strides = array<i32>} : memref<1x1x256xf32, #tpu.memory_space<vmem>>, vector<1x1x256xf32>,
    %22 = tpu.iota {dimensions = array<i32: 1>} : vector<1x256xi32>
    %c256_i32 = arith.constant 256 : i32
    %23 = arith.muli %arg1, %c256_i32 : i32
    %24 = vector.broadcast %23 : i32 to vector<1x256xi32>
    %25 = arith.addi %24, %22 : vector<1x256xi32>
    %c256_i32_19 = arith.constant 256 : i32
    %26 = vector.broadcast %c256_i32_19 : i32 to vector<1x256xi32>
    %27 = arith.cmpi slt, %25, %26 : vector<1x256xi32>
    %cst_20 = arith.constant 0.000000e+00 : f32
    %28 = vector.broadcast %cst_20 : f32 to vector<1x256xf32>
    %29 = arith.select %27, %18, %28 : vector<1x256xi1>, vector<1x256xf32>
    %cst_21 = arith.constant dense<0.000000e+00> : vector<1xf32>
    %30 = vector.multi_reduction <add>, %29, %cst_21 [1] : vector<1x256xf32> to vector<1xf32>
    %31 = vector.shape_cast %30 : vector<1xf32> to vector<1x1xf32>
    %32 = arith.mulf %29, %29 : vector<1x256xf32>
    %cst_22 = arith.constant dense<0.000000e+00> : vector<1xf32>
    %33 = vector.multi_reduction <add>, %32, %cst_22 [1] : vector<1x256xf32> to vector<1xf32>
    %34 = vector.shape_cast %33 : vector<1xf32> to vector<1x1xf32>
    %35 = tpu.concatenate %31, %34 in 1 : vector<1x1xf32>, vector<1x1xf32> -> vector<1x2xf32>
    %c0_23 = arith.constant 0 : index
    %c0_24 = arith.constant 0 : index
    %c0_25 = arith.constant 0 : index
    %c0_26 = arith.constant 0 : index
    %36 = vector.load %arg9[%c0_23, %c0_24, %c0_25, %c0_26] : memref<1x1x1x2xf32, #tpu.memory_space<vmem>>, vector<1x1x1x2xf32>
    %37 = vector.shape_cast %36 : vector<1x1x1x2xf32> to vector<1x2xf32>
    %38 = vector.shape_cast %35 : vector<1x2xf32> to vector<1x1x1x2xf32>
    tpu.vector_store %arg9[%c0_23, %c0_24, %c0_25, %c0_26], %38 {strides = array<i32>} : memref<1x1x1x2xf32, #tpu.memory_space<vmem>>, vector<1x1x1x2xf32>,
    return
  }
  func.func @transform_0(%arg0: i32, %arg1: i32) -> (i32, i32, i32) {
    %c0_i32 = arith.constant 0 : i32
    %c0_i32_0 = arith.constant 0 : i32
    return %arg0, %c0_i32, %arg1 : i32, i32, i32
  }
  func.func @transform_1(%arg0: i32, %arg1: i32) -> (i32, i32, i32) {
    %c0_i32 = arith.constant 0 : i32
    %c0_i32_0 = arith.constant 0 : i32
    return %arg0, %c0_i32, %arg1 : i32, i32, i32
  }
  func.func @transform_2(%arg0: i32, %arg1: i32) -> (i32, i32) {
    %c0_i32 = arith.constant 0 : i32
    %c0_i32_0 = arith.constant 0 : i32
    %c0_i32_1 = arith.constant 0 : i32
    return %c0_i32, %c0_i32_0 : i32, i32
  }
  func.func @transform_3(%arg0: i32, %arg1: i32) -> (i32, i32) {
    %c0_i32 = arith.constant 0 : i32
    %c0_i32_0 = arith.constant 0 : i32
    %c0_i32_1 = arith.constant 0 : i32
    return %c0_i32, %c0_i32_0 : i32, i32
  }
  func.func @transform_4(%arg0: i32, %arg1: i32) -> (i32, i32) {
    %c0_i32 = arith.constant 0 : i32
    %c0_i32_0 = arith.constant 0 : i32
    %c0_i32_1 = arith.constant 0 : i32
    return %c0_i32, %c0_i32_0 : i32, i32
  }
  func.func @transform_5(%arg0: i32, %arg1: i32) -> (i32, i32) {
    %c0_i32 = arith.constant 0 : i32
    %c0_i32_0 = arith.constant 0 : i32
    %c0_i32_1 = arith.constant 0 : i32
    return %c0_i32, %c0_i32_0 : i32, i32
  }
  func.func @transform_6(%arg0: i32, %arg1: i32) -> (i32, i32, i32) {
    %c0_i32 = arith.constant 0 : i32
    %c0_i32_0 = arith.constant 0 : i32
    return %arg0, %c0_i32, %arg1 : i32, i32, i32
  }
  func.func @transform_7(%arg0: i32, %arg1: i32) -> (i32, i32, i32, i32) {
    %c0_i32 = arith.constant 0 : i32
    %c0_i32_0 = arith.constant 0 : i32
    %c0_i32_1 = arith.constant 0 : i32
    return %arg0, %arg1, %c0_i32, %c0_i32_0 : i32, i32, i32, i32
  }
}

module attributes {stable_mosaic.version = 11 : i64} {
  func.func @_gate_kernel(%arg0: i32, %arg1: i32, %arg2: memref<1x4x256xf32, #tpu.memory_space<vmem>>, %arg3: memref<1x1x256xf32, #tpu.memory_space<vmem>>, %arg4: memref<2xf32, #tpu.memory_space<smem>>, %arg5: memref<1x4x256xf32, #tpu.memory_space<vmem>>) attributes {dimension_semantics = [#tpu.dimension_semantics<parallel>, #tpu.dimension_semantics<parallel>], iteration_bounds = array<i64: 2, 1>, scalar_prefetch = 0 : i64, scratch_operands = 0 : i64, tpu.core_type = #tpu.core_type<tc>, window_params = [{transform_indices = @transform_0, window_bounds = array<i64: 1, 4, 256>}, {transform_indices = @transform_1, window_bounds = array<i64: 1, 1, 256>}, {transform_indices = @transform_2, window_bounds = array<i64: 2>}, {transform_indices = @transform_3, window_bounds = array<i64: 1, 4, 256>}]} {
    %c0 = arith.constant 0 : index
    %0 = memref.load %arg4[%c0] : memref<2xf32, #tpu.memory_space<smem>>
    %c1 = arith.constant 1 : index
    %1 = memref.load %arg4[%c1] : memref<2xf32, #tpu.memory_space<smem>>
    %c0_0 = arith.constant 0 : index
    %c0_1 = arith.constant 0 : index
    %c0_2 = arith.constant 0 : index
    %2 = vector.load %arg3[%c0_0, %c0_1, %c0_2] : memref<1x1x256xf32, #tpu.memory_space<vmem>>, vector<1x1x256xf32>
    %3 = vector.shape_cast %2 : vector<1x1x256xf32> to vector<1x256xf32>
    %4 = vector.broadcast %0 : f32 to vector<1x256xf32>
    %5 = arith.mulf %3, %4 : vector<1x256xf32>
    %6 = vector.broadcast %1 : f32 to vector<1x256xf32>
    %7 = arith.addf %5, %6 : vector<1x256xf32>
    %8 = arith.negf %7 : vector<1x256xf32>
    %9 = math.exp %8 : vector<1x256xf32>
    %cst = arith.constant 1.000000e+00 : f32
    %10 = vector.broadcast %cst : f32 to vector<1x256xf32>
    %11 = arith.addf %10, %9 : vector<1x256xf32>
    %12 = arith.divf %10, %11 : vector<1x256xf32>
    %c0_3 = arith.constant 0 : index
    %c0_4 = arith.constant 0 : index
    %c0_5 = arith.constant 0 : index
    %13 = vector.load %arg2[%c0_3, %c0_4, %c0_5] : memref<1x4x256xf32, #tpu.memory_space<vmem>>, vector<1x4x256xf32>
    %14 = vector.shape_cast %13 : vector<1x4x256xf32> to vector<4x256xf32>
    %15 = vector.broadcast %12 : vector<1x256xf32> to vector<4x256xf32>
    %16 = arith.mulf %14, %15 : vector<4x256xf32>
    %c0_6 = arith.constant 0 : index
    %c0_7 = arith.constant 0 : index
    %c0_8 = arith.constant 0 : index
    %17 = vector.load %arg5[%c0_6, %c0_7, %c0_8] : memref<1x4x256xf32, #tpu.memory_space<vmem>>, vector<1x4x256xf32>
    %18 = vector.shape_cast %17 : vector<1x4x256xf32> to vector<4x256xf32>
    %19 = vector.shape_cast %16 : vector<4x256xf32> to vector<1x4x256xf32>
    tpu.vector_store %arg5[%c0_6, %c0_7, %c0_8], %19 {strides = array<i32>} : memref<1x4x256xf32, #tpu.memory_space<vmem>>, vector<1x4x256xf32>,
    return
  }
  func.func @transform_0(%arg0: i32, %arg1: i32) -> (i32, i32, i32) {
    %c0_i32 = arith.constant 0 : i32
    %c0_i32_0 = arith.constant 0 : i32
    return %arg0, %c0_i32, %arg1 : i32, i32, i32
  }
  func.func @transform_1(%arg0: i32, %arg1: i32) -> (i32, i32, i32) {
    %c0_i32 = arith.constant 0 : i32
    %c0_i32_0 = arith.constant 0 : i32
    return %arg0, %c0_i32, %arg1 : i32, i32, i32
  }
  func.func @transform_2(%arg0: i32, %arg1: i32) -> i32 {
    %c0_i32 = arith.constant 0 : i32
    %c0_i32_0 = arith.constant 0 : i32
    return %c0_i32 : i32
  }
  func.func @transform_3(%arg0: i32, %arg1: i32) -> (i32, i32, i32) {
    %c0_i32 = arith.constant 0 : i32
    %c0_i32_0 = arith.constant 0 : i32
    return %arg0, %c0_i32, %arg1 : i32, i32, i32
  }
}

</mosaic_0001>

<bundles_post_ra>
// kernel: attention_block.5
= control target key start
LH: loop header
LB: loop body
LE: loop exit
PB: predicated region body
PF: predicated region fallthrough
CT: control target
= control target key end

     0   :  { %8 = vsyncpa [#allocation3], 0  ;;  %s528_s12 = smov 0   ;;  %s530_s13 = smov 0   ;;  %s572_s0 = inlined_call_operand.vmem [shape: f32[2,4,256], index: 0, kind: input, shape index: {}, may-alias: {0,3}]   ;;  %s573_s1 = inlined_call_operand.vmem [shape: f32[2,1,256], index: 1, kind: input, shape index: {}]   ;;  %s574_s2 = inlined_call_operand.vmem [shape: f32[2], index: 2, kind: input, shape index: {}]   ;;  %s575_s3 = inlined_call_operand.vmem [shape: f32[2,4,256], index: 3, kind: output, shape index: {}, may-alias: {0,3}]  }
   0x1   :  { %s532_s14 = smov 0  }
   0x2 LB: > { %s407_s15 = sadd.s32 4294967295, %s505_s14   ;;  %s26_s16 = sadd.s32 1, %s501_s13  ;;  %s505_s14 = sphi %s532_s14, %s14_s14   ;;  %s501_s13 = sphi %s530_s13, %s577_s13   ;;  %s497_s12 = sphi %s528_s12, %s576_s12  }
   0x3   : > { %p28_p0 = scmp.ge.s32.totalorder %s26_s16, 2  ;;  %p409_p1 = scmp.ge.s32.totalorder %s505_s14, 1 }
   0x4   : > { %p136_p2 = scmp.lt.s32.totalorder %s505_s14, 3  ;;  %p433_p4 = scmp.eq.s32.totalorder %s407_s15, 0 }
   0x5   : > { %s579_s16 = smov (%p28_p0, %s26_s16), 0  ;;  %s148_s19 = sshll.u32 %s574_s2, 4  ;;  %s149_s19 = int_to_ptr.vmem [resolvable:$true] %s148_s19 }
   0x6   : > { %p137_p3 = pnand %p409_p1, %p136_p2  ;;  %s507_s20 = smov [#allocation2]  }
   0x8   : > { %p429_p5 = pneg %p137_p3  ;;  %186 = sbr.rel (%p137_p3) target bundleno = 63 (0x3f), region = 32 }
   0xa   : > { %p430_p6 = pnand %p433_p4, %p429_p5 }
   0xc   : > { %432 = dma.vmem_to_smem (!%p430_p6), %s149_s19, 16, %s507_s20, [#allocation3]  }
   0xd   : > { %492 = dma.done.wait (%p433_p4), [#allocation3], 16  }
   0xe   : > { %494 = vsyncadd (%p433_p4), [#allocation3], 4294967280 }
   0xf   : > { %193 = sfence }
  0x10   : > { %p229_p7 = scmp.lt.s32.totalorder %s497_s12, 1  ;;  %s257_s21 = sld [smem:[#allocation2]]  ;;  %vm288_vm4 = vcmask 1043456  }
  0x11   : > { %s419_s22 = sld [smem:[#allocation2 + $0x1]] }
  0x12   : > { %s581_s12 = smov (!%p229_p7, %s497_s12), 1 }
  0x13   : > { %s416_s23 = sshll.u32 %s581_s12, 1  ;;  %s423_s27 = sshll.u32 %s581_s12, 3 }
  0x14   : > { %s245_s26 = scalar_lea.vmem %s573_s1, %s416_s23  ;;  %s236_s30 = scalar_lea.vmem %s572_s0, %s423_s27 }
  0x15   : > { %v259_v0 = vld [vmem:[%s245_s26] sm:$0x3]  ;;  %s255_s6 = scalar_lea.vmem %s575_s3, %s423_s27 }
  0x16   : > { %v260_v1 = vstv %s257_s21  ;;  %v283_v20 = vld [vmem:[%s236_s30] sm:$0xff] }
  0x17   : > { %v261_v2 = vmul.f32 %v260_v1, %v259_v0  ;;  %v262_v3 = vstv %s419_s22 }
  0x19   : > { %v263_v4 = vadd.f32 %v262_v3, %v261_v2 }
  0x1b   : > { %v420_v5 = vmul.f32 -1.442695, %v263_v4 }
  0x1d   : > { %460 = vpow2.f32 %v420_v5 }
  0x23   : > { %v461_v6 = vpop.eup %460 }
  0x24   : > { %v267_v7 = vadd.f32 1.0, %v461_v6 }
  0x26   : > { %462 = vrcp.f32 %v267_v7  ;;  %v279_v10 = vand.u32 2147483648, %v267_v7  ;;  %vm273_vm0 = vweird.f32 %v267_v7  ;;  %v277_v12 = vand.u32 2147483647, %v267_v7 }
  0x28   : > { %v280_v14 = vor.u32 1.1754944e-38, %v279_v10  ;;  %vm278_vm3 = vcmp.eq.f32.partialorder %v277_v12, 8.507059e+37 }
  0x2c   : > { %v463_v8 = vpop.eup %462 }
  0x2d   : > { %v269_v9 = vmul.f32 %v463_v8, %v267_v7  ;;  %vm274_vm1 = vweird.f32 %v463_v8 }
  0x2e   : > { %vm275_vm2 = vmor %vm273_vm0, %vm274_vm1 }
  0x2f   : > { %v270_v11 = vsub.f32 1.0, %v269_v9 }
  0x31   : > { %v271_v13 = vmul.f32 %v463_v8, %v270_v11 }
  0x33   : > { %v272_v15 = vadd.f32 %v463_v8, %v271_v13 }
  0x35   : > { %v276_v16 = vsel %vm275_vm2, %v463_v8, %v272_v15 }
  0x36   : > { %v281_v17 = vsel %vm278_vm3, %v280_v14, %v276_v16 }
  0x37   : > { %v285_v18 = vperm.slane %v281_v17, 0  ;;  %v286_v19 = vperm.slane %v281_v17, 1 }
  0x39   : > { %v287_v21 = vrot.slane %v286_v19, 4 }
  0x3b   : > { %v289_v22 = vsel %vm288_vm4, %v285_v18, %v287_v21 }
  0x3c   : > { %v291_v23 = vmul.f32 %v289_v22, %v283_v20 }
  0x3e   : > { %292 = vst [vmem:[%s255_s6] sm:$0xff] %v291_v23 }
  0x3f PF: > { %s14_s14 = sadd.s32 1, %s505_s14   ;;  %s576_s12 = smov %s501_s13 }
  0x40   : > { %p11_p8 = scmp.ge.s32.totalorder %s14_s14, 4   ;;  %s577_s13 = smov %s579_s16 }
  0x42   :  { %13 = sbr.rel (!%p11_p8) target bundleno = 2 (0x2), region = 70 }
  0x47   :  { %323 = vsyncpa [#allocation3], 1 }
  0x48   :  { %325 = vsyncpa [#allocation3 + $0x1], 1 }

// kernel: attention_block.4
= control target key start
LH: loop header
LB: loop body
LE: loop exit
PB: predicated region body
PF: predicated region fallthrough
CT: control target
= control target key end

     0   :  { %s788_s24 = smov 0   ;;  %s790_s25 = smov 0   ;;  %s844_s0 = inlined_call_operand.vmem [shape: f32[2,4,256], index: 0, kind: input, shape index: {}]   ;;  %s845_s1 = inlined_call_operand.vmem [shape: f32[2,4,256], index: 1, kind: input, shape index: {}]   ;;  %s846_s2 = inlined_call_operand.vmem [shape: f32[8,4], index: 2, kind: input, shape index: {}]   ;;  %s847_s3 = inlined_call_operand.vmem [shape: f32[8,4], index: 3, kind: input, shape index: {}]   ;;  %s848_s4 = inlined_call_operand.vmem [shape: f32[8,1], index: 4, kind: input, shape index: {}]   ;;  %s849_s5 = inlined_call_operand.vmem [shape: f32[8,1], index: 5, kind: input, shape index: {}]   ;;  %s850_s6 = inlined_call_operand.vmem [shape: f32[2,1,256], index: 6, kind: output, shape index: {0}]   ;;  %s851_s7 = inlined_call_operand.vmem [shape: f32[2,1,1,2], index: 7, kind: output, shape index: {1}]  }
   0x1   :  { %s792_s26 = smov 0  }
   0x2 LB: > { %s30_s27 = sadd.s32 1, %s741_s25  ;;  %p679_p0 = scmp.ge.s32.totalorder %s745_s26, 1  ;;  %s745_s26 = sphi %s792_s26, %s18_s26   ;;  %s741_s25 = sphi %s790_s25, %s853_s25   ;;  %s737_s24 = sphi %s788_s24, %s852_s24  }
   0x3   : > { %p32_p1 = scmp.ge.s32.totalorder %s30_s27, 2  ;;  %p280_p2 = scmp.lt.s32.totalorder %s745_s26, 3 }
   0x5   : > { %s855_s27 = smov (%p32_p1, %s30_s27), 0  ;;  %p281_p3 = pnand %p679_p0, %p280_p2 }
   0x6   : > { %p335_p4 = scmp.lt.s32.totalorder (!%p281_p3), %s737_s24, 1 }
   0x7   : > { %284 = sbr.rel (%p281_p3) target bundleno = 313 (0x139), region = 44 }
   0xc   : > { %v747_v0 = vmov 0   ;;  %v477_v1 = vld [vmem:[%s848_s4] sm:$0xff]  ;;  %s857_s24 = smov (!%p335_p4, %s737_s24), 1  ;;  %vm381_vm0 = vcmask 1043456   ;;  %vm377_vm1 = vcmask 31744   ;;  %v513_v35 = vlaneseq }
   0xd   : > { %722 = vset.pattern.permute.xlu0 %v747_v0  ;;  %s695_s30 = sshll.u32 %s857_s24, 3  ;;  %v487_v3 = vld [vmem:[%s849_s5] sm:$0xff]  ;;  %s684_s20 = sshll.u32 %s857_s24, 1  ;;  %vm510_vm2 = vcmask 1040384   ;;  %vm537_vm4 = vcmask 7168   ;;  %vm539_vm5 = vcmask 8192  }
   0xe   : > { %480 = vperm.xlu0 %722, %v477_v1   ;;  %s352_s10 = scalar_lea.vmem %s845_s1, %s695_s30  ;;  %s342_s15 = scalar_lea.vmem %s844_s0, %s695_s30  ;;  %v371_v5 = vld [vmem:[%s847_s3] sm:$0xff]  ;;  %vm515_vm3 = vcmp.lt.s32.totalorder %v513_v35, 256 }
   0xf   : > { %v372_v2 = vld [vmem:[%s352_s10] sm:$0xff]  ;;  %s361_s23 = scalar_lea.vmem %s850_s6, %s684_s20  ;;  %s368_s30 = scalar_lea.vmem %s851_s7, %s857_s24 }
  0x10   : > { %374 = vst [vmem:[#allocation1] ss:$2 sm:$0xff] %v372_v2  ;;  %v370_v4 = vld [vmem:[%s342_s15] sm:$0xff] }
  0x11   : > { %v369_v8 = vld [vmem:[%s846_s2] sm:$0xff] }
  0x16   : > { %490 = vperm.xlu0 %722, %v487_v3  }
  0x17   : > { %v375_v6 = vld.sshfl [vmem:[#allocation1] sm:$0xff pattern:$0x75316420]  ;;  %v376_v7 = vld.sshfl [vmem:[#allocation1 + $0x8] sm:$0xff pattern:$0x75316420] }
  0x18   : > { %427 = vst [vmem:[#allocation1] ss:$2 sm:$0xff] %v370_v4  ;;  %685 = vmatpush.msk.msra.mxu0 %vm381_vm0, %v375_v6  ;;  %687 = vmatpush.msk.msra.mxu1 %vm381_vm0, %v376_v7 }
  0x19   : > { %686 = vmatmul.msk.f32.vlgmr.msra.gmra.mxu0 %vm377_vm1, %v371_v5  ;;  %688 = vmatmul.msk.f32.vlgmr.msra.gmra.mxu1 %vm377_vm1, %v371_v5 }
  0x1f   : > { %v428_v9 = vld.sshfl [vmem:[#allocation1] sm:$0xff pattern:$0x75316420]  ;;  %v429_v10 = vld.sshfl [vmem:[#allocation1 + $0x8] sm:$0xff pattern:$0x75316420] }
  0x20   : > { %689 = vmatpush.msk.msra.mxu2 %vm381_vm0, %v428_v9  ;;  %691 = vmatpush.msk.msra.mxu3 %vm381_vm0, %v429_v10 }
  0x21   : > { %690 = vmatmul.msk.f32.vlgmr.msra.gmra.mxu2 %vm377_vm1, %v369_v8  ;;  %692 = vmatmul.msk.f32.vlgmr.msra.gmra.mxu3 %vm377_vm1, %v369_v8 }
  0x80   : > { %v481_v11 = vpop.permute.xlu0 %480 }
  0x88   : > { %v491_v22 = vpop.permute.xlu0 %490 }
  0x96   : > { %v403_v12 = vpop.f32.mrf.mxu0  ;;  %v423_v13 = vpop.f32.mrf.mxu1 }
  0xa4   : > { %v454_v14 = vpop.f32.mrf.mxu2  ;;  %v474_v15 = vpop.f32.mrf.mxu3 }
  0xa5   : > { %v455_v16 = vadd.f32 %v454_v14, %v403_v12  ;;  %v475_v17 = vadd.f32 %v474_v15, %v423_v13 }
  0xa7   : > { %v483_v18 = vadd.f32 %v481_v11, %v455_v16  ;;  %v484_v19 = vadd.f32 %v481_v11, %v475_v17 }
  0xa9   : > { %v485_v20 = vmax.f32 %v483_v18, 0.0  ;;  %v486_v21 = vmax.f32 %v484_v19, 0.0 }
  0xab   : > { %v493_v23 = vmul.f32 %v491_v22, %v485_v20  ;;  %v494_v24 = vmul.f32 %v491_v22, %v486_v21 }
  0xad   : > { %v495_v25 = vrot.slane %v493_v23, 4  ;;  %v501_v26 = vrot.slane %v494_v24, 4 }
  0xaf   : > { %v496_v27 = vadd.f32 %v495_v25, %v493_v23  ;;  %v502_v28 = vadd.f32 %v501_v26, %v494_v24 }
  0xb1   : > { %v497_v29 = vrot.slane %v496_v27, 2  ;;  %v503_v30 = vrot.slane %v502_v28, 2 }
  0xb3   : > { %v498_v31 = vadd.f32 %v497_v29, %v496_v27  ;;  %v504_v32 = vadd.f32 %v503_v30, %v502_v28 }
  0xb5   : > { %v499_v33 = vrot.slane %v498_v31, 1  ;;  %v505_v34 = vrot.slane %v504_v32, 1 }
  0xb7   : > { %v500_v36 = vadd.f32 %v499_v33, %v498_v31  ;;  %v506_v37 = vadd.f32 %v505_v34, %v504_v32 }
  0xb9   : > { %v509_v38 = vrot.slane %v506_v37, 7  ;;  %v529_v39 = vadd.f32 %v506_v37, %v500_v36  ;;  %v532_v41 = vmul.f32 %v500_v36, %v500_v36  ;;  %v533_v42 = vmul.f32 %v506_v37, %v506_v37 }
  0xbb   : > { %530 = vadd.xlane.f32.xlu1 %v529_v39  ;;  %v511_v40 = vsel %vm510_vm2, %v500_v36, %v509_v38  ;;  %v534_v43 = vadd.f32 %v533_v42, %v532_v41 }
  0xbc   : > { %517 = vst.msk [vmem:[%s361_s23] sm:$0x3] %vm515_vm3, %v511_v40 }
  0xc3   : > { %535 = vadd.xlane.f32.xlu1 %v534_v43 }
 0x12e   : > { %v531_v44 = vpop.xlane.xlu1 %530 }
 0x136   : > { %v536_v45 = vpop.xlane.xlu1 %535 }
 0x137   : > { %v538_v46 = vsel %vm537_vm4, %v531_v44, %v536_v45 }
 0x138   : > { %540 = vst.msk [vmem:[%s368_s30] sm:$0x1] %vm539_vm5, %v538_v46 }
 0x139 PF: > { %s18_s26 = sadd.s32 1, %s745_s26   ;;  %s852_s24 = smov %s741_s25 }
 0x13a   : > { %p15_p5 = scmp.ge.s32.totalorder %s18_s26, 4   ;;  %s853_s25 = smov %s855_s27 }
 0x13c   :  { %17 = sbr.rel (!%p15_p5) target bundleno = 2 (0x2), region = 89 }

// kernel: attention_block.3
= control target key start
LH: loop header
LB: loop body
LE: loop exit
PB: predicated region body
PF: predicated region fallthrough
CT: control target
= control target key end

     0   :  { %s589_s15 = smov 0   ;;  %s591_s16 = smov 0   ;;  %s641_s0 = inlined_call_operand.vmem [shape: f32[2,4,256], index: 0, kind: input, shape index: {}]   ;;  %s642_s1 = inlined_call_operand.vmem [shape: f32[2,4,256], index: 1, kind: input, shape index: {}]   ;;  %s643_s2 = inlined_call_operand.vmem [shape: f32[8,4], index: 2, kind: input, shape index: {}]   ;;  %s644_s3 = inlined_call_operand.vmem [shape: f32[8,4], index: 3, kind: input, shape index: {}]   ;;  %s645_s4 = inlined_call_operand.vmem [shape: f32[2,1,8,4], index: 4, kind: output, shape index: {}]  }
   0x1   :  { %s593_s17 = smov 0  }
   0x2 LB: > { %s26_s18 = sadd.s32 1, %s558_s16  ;;  %p498_p0 = scmp.ge.s32.totalorder %s562_s17, 1  ;;  %s562_s17 = sphi %s593_s17, %s14_s17   ;;  %s558_s16 = sphi %s591_s16, %s647_s16   ;;  %s554_s15 = sphi %s589_s15, %s646_s15  }
   0x3   : > { %p28_p1 = scmp.ge.s32.totalorder %s26_s18, 2  ;;  %p200_p2 = scmp.lt.s32.totalorder %s562_s17, 3 }
   0x5   : > { %s649_s18 = smov (%p28_p1, %s26_s18), 0  ;;  %p201_p3 = pnand %p498_p0, %p200_p2 }
   0x6   : > { %p242_p4 = scmp.lt.s32.totalorder (!%p201_p3), %s554_s15, 1 }
   0x7   : > { %204 = sbr.rel (%p201_p3) target bundleno = 293 (0x125), region = 36 }
   0xc   : > { %s651_s15 = smov (!%p242_p4, %s554_s15), 1  ;;  %vm278_vm0 = vcmask 1043456   ;;  %v268_v2 = vld [vmem:[%s643_s2] sm:$0xff]  ;;  %vm274_vm1 = vcmask 31744   ;;  %vm392_vm2 = vcmask 7168   ;;  %vm394_vm3 = vcmask 15360  }
   0xd   : > { %s607_s19 = sshll.u32 %s651_s15, 3  ;;  %v323_v5 = vld [vmem:[%s644_s3] sm:$0xff]  ;;  %vm396_vm4 = vcmask 23552  }
   0xe   : > { %s249_s22 = scalar_lea.vmem %s641_s0, %s607_s19  ;;  %s259_s25 = scalar_lea.vmem %s642_s1, %s607_s19 }
   0xf   : > { %v269_v0 = vld [vmem:[%s249_s22] sm:$0xff]  ;;  %s267_s6 = scalar_lea.vmem %s645_s4, %s607_s19 }
  0x10   : > { %271 = vst [vmem:[#allocation1] ss:$2 sm:$0xff] %v269_v0  ;;  %v324_v1 = vld [vmem:[%s259_s25] sm:$0xff] }
  0x17   : > { %v272_v3 = vld.sshfl [vmem:[#allocation1] sm:$0xff pattern:$0x75316420]  ;;  %v273_v4 = vld.sshfl [vmem:[#allocation1 + $0x8] sm:$0xff pattern:$0x75316420] }
  0x18   : > { %504 = vmatpush.msk.msra.mxu0 %vm278_vm0, %v272_v3  ;;  %506 = vmatpush.msk.msra.mxu1 %vm278_vm0, %v273_v4  ;;  %326 = vst [vmem:[#allocation1] ss:$2 sm:$0xff] %v324_v1 }
  0x19   : > { %505 = vmatmul.msk.f32.vlgmr.msra.gmra.mxu0 %vm274_vm1, %v268_v2  ;;  %507 = vmatmul.msk.f32.vlgmr.msra.gmra.mxu1 %vm274_vm1, %v268_v2 }
  0x1f   : > { %v327_v6 = vld.sshfl [vmem:[#allocation1] sm:$0xff pattern:$0x75316420]  ;;  %v328_v7 = vld.sshfl [vmem:[#allocation1 + $0x8] sm:$0xff pattern:$0x75316420] }
  0x20   : > { %508 = vmatpush.msk.msra.mxu2 %vm278_vm0, %v327_v6  ;;  %510 = vmatpush.msk.msra.mxu3 %vm278_vm0, %v328_v7 }
  0x21   : > { %509 = vmatmul.msk.f32.vlgmr.msra.gmra.mxu2 %vm274_vm1, %v323_v5  ;;  %511 = vmatmul.msk.f32.vlgmr.msra.gmra.mxu3 %vm274_vm1, %v323_v5 }
  0x96   : > { %v300_v8 = vpop.f32.mrf.mxu0  ;;  %v320_v9 = vpop.f32.mrf.mxu1 }
  0x97   : > { %v376_v10 = vadd.f32 %v320_v9, %v300_v8  ;;  %v379_v11 = vmul.f32 %v300_v8, %v300_v8  ;;  %v380_v12 = vmul.f32 %v320_v9, %v320_v9 }
  0x99   : > { %377 = vadd.xlane.f32.xlu0 %v376_v10  ;;  %v381_v13 = vadd.f32 %v380_v12, %v379_v11 }
  0xa1   : > { %382 = vadd.xlane.f32.xlu0 %v381_v13 }
  0xa4   : > { %v353_v14 = vpop.f32.mrf.mxu2  ;;  %v373_v15 = vpop.f32.mrf.mxu3 }
  0xa5   : > { %v384_v16 = vadd.f32 %v373_v15, %v353_v14  ;;  %v387_v17 = vmul.f32 %v353_v14, %v353_v14  ;;  %v388_v18 = vmul.f32 %v373_v15, %v373_v15 }
  0xa7   : > { %385 = vadd.xlane.f32.xlu1 %v384_v16  ;;  %v389_v19 = vadd.f32 %v388_v18, %v387_v17 }
  0xaf   : > { %390 = vadd.xlane.f32.xlu1 %v389_v19 }
 0x10c   : > { %v378_v20 = vpop.xlane.xlu0 %377 }
 0x114   : > { %v383_v22 = vpop.xlane.xlu0 %382 }
 0x115   : > { %v393_v23 = vsel %vm392_vm2, %v378_v20, %v383_v22 }
 0x11a   : > { %v386_v21 = vpop.xlane.xlu1 %385 }
 0x11b   : > { %v395_v24 = vsel %vm394_vm3, %v393_v23, %v386_v21 }
 0x122   : > { %v391_v25 = vpop.xlane.xlu1 %390 }
 0x123   : > { %v397_v26 = vsel %vm396_vm4, %v395_v24, %v391_v25 }
 0x124   : > { %398 = vst.msk [vmem:[%s267_s6] sm:$0xff] %vm274_vm1, %v397_v26 }
 0x125 PF: > { %s14_s17 = sadd.s32 1, %s562_s17   ;;  %s646_s15 = smov %s558_s16 }
 0x126   : > { %p11_p5 = scmp.ge.s32.totalorder %s14_s17, 4   ;;  %s647_s16 = smov %s649_s18 }
 0x128   :  { %13 = sbr.rel (!%p11_p5) target bundleno = 2 (0x2), region = 69 }

</bundles_post_ra>
